<compile_context>
chip_gen: v6e
topology: v6e:2x2x1
jax: 0.10.0
libtpu: 0.0.40
codegen_flags: <defaults>
</compile_context>

<pallas_src>
import jax
import jax.numpy as jnp
from jax.experimental import pallas as pl
from jax.experimental.pallas import tpu as pltpu

_EPS = 1e-12            # F.normalize default eps
_EPS2 = _EPS * _EPS     # compare against sum-of-squares


def _round_up(x, m):
    return ((x + m - 1) // m) * m


def _normed_linear_kernel(x_ref, w_ref, o_ref, acc_ref, xsq_ref, wsq_ref):
    k = pl.program_id(2)

    @pl.when(k == 0)
    def _init():
        acc_ref[...] = jnp.zeros_like(acc_ref)
        xsq_ref[...] = jnp.zeros_like(xsq_ref)
        wsq_ref[...] = jnp.zeros_like(wsq_ref)

    x = x_ref[...]          # native dtype -> MXU directly
    w = w_ref[...]

    # Matmul accumulation in f32.
    acc_ref[...] += jnp.dot(x, w, preferred_element_type=jnp.float32)

    # Sum-of-squares accumulation (f32) for the folded normalization scales.
    xf = x.astype(jnp.float32)
    wf = w.astype(jnp.float32)
    xsq_ref[...] += jnp.sum(xf * xf, axis=1, keepdims=True)   # (tm, 1)
    wsq_ref[...] += jnp.sum(wf * wf, axis=0, keepdims=True)   # (1, tn)

    @pl.when(k == pl.num_programs(2) - 1)
    def _finalize():
        inv_x = jax.lax.rsqrt(jnp.maximum(xsq_ref[...], _EPS2))  # 1/max(|x|, eps)
        inv_w = jax.lax.rsqrt(jnp.maximum(wsq_ref[...], _EPS2))  # 1/max(|w|, eps)
        o_ref[...] = (acc_ref[...] * inv_x * inv_w).astype(o_ref.dtype)


def normed_linear(x, weight, *, tm=256, tn=256, tk=512):
    """out = F.normalize(x, dim=1) @ F.normalize(weight, dim=0).

    x: (M, K), weight: (K, N) -> (M, N), output dtype follows x.dtype.
    """
    M, K = x.shape
    Kw, N = weight.shape
    assert K == Kw, (K, Kw)
    out_dtype = x.dtype

    # Clamp tiles to the (aligned) problem size; keep (8, 128) alignment.
    tm = min(tm, _round_up(M, 8))
    tn = min(tn, _round_up(N, 128))
    tk = min(tk, _round_up(K, 128))

    Mp = _round_up(M, tm)
    Np = _round_up(N, tn)
    Kp = _round_up(K, tk)

    xp = x if (Mp == M and Kp == K) else jnp.pad(x, ((0, Mp - M), (0, Kp - K)))
    wp = weight if (Kp == K and Np == N) else jnp.pad(
        weight, ((0, Kp - K), (0, Np - N)))

    # VMEM budget: double-buffered input/output tiles + f32 accumulator.
    x_b = jnp.dtype(x.dtype).itemsize
    w_b = jnp.dtype(weight.dtype).itemsize
    o_b = jnp.dtype(out_dtype).itemsize
    tile_bytes = (
        2 * tm * tk * x_b          # x tiles (double-buffered)
        + 2 * tk * tn * w_b        # w tiles (double-buffered)
        + 2 * tm * tn * o_b        # out tiles (double-buffered)
        + tm * tn * 4              # f32 accumulator
        + (tm + tn) * 4 * 128      # sumsq scratch (lane-padded, generous)
    )
    vmem_limit = int(min(max(2 * tile_bytes, 16 * 1024 * 1024),
                         64 * 1024 * 1024))

    out = pl.pallas_call(
        _normed_linear_kernel,
        out_shape=jax.ShapeDtypeStruct((Mp, Np), out_dtype),
        grid_spec=pltpu.PrefetchScalarGridSpec(
            num_scalar_prefetch=0,
            grid=(Mp // tm, Np // tn, Kp // tk),
            in_specs=[
                pl.BlockSpec((tm, tk), lambda i, j, k: (i, k)),
                pl.BlockSpec((tk, tn), lambda i, j, k: (k, j)),
            ],
            out_specs=pl.BlockSpec((tm, tn), lambda i, j, k: (i, j)),
            scratch_shapes=[
                pltpu.VMEM((tm, tn), jnp.float32),   # matmul accumulator
                pltpu.VMEM((tm, 1), jnp.float32),    # per-row sum(x^2)
                pltpu.VMEM((1, tn), jnp.float32),    # per-col sum(w^2)
            ],
        ),
        compiler_params=pltpu.CompilerParams(
            dimension_semantics=("parallel", "parallel", "arbitrary"),
            vmem_limit_bytes=vmem_limit,
        ),
    )(xp, wp)

    if Mp != M or Np != N:
        out = out[:M, :N]
    return out


def init_weight(key, in_features, out_features):
    """Replica of: weight.uniform_(-1, 1).renorm_(2, 1, 1e-5).mul_(1e5)."""
    w = jax.random.uniform(
        key, (in_features, out_features), minval=-1.0, maxval=1.0,
        dtype=jnp.float32,
    )
    col_norm = jnp.linalg.norm(w, axis=0, keepdims=True)
    maxnorm = 1e-5
    scale = jnp.where(col_norm > maxnorm, maxnorm / (col_norm + 1e-7), 1.0)
    return w * scale * 1e5


def reference(x, weight):
    xn = x / jnp.maximum(jnp.linalg.norm(x, axis=1, keepdims=True), _EPS)
    wn = weight / jnp.maximum(jnp.linalg.norm(weight, axis=0, keepdims=True), _EPS)
    return xn @ wn


if __name__ == "__main__":
    key = jax.random.PRNGKey(0)
    kx1, kw1, kx2, kw2 = jax.random.split(key, 4)

    # Small shape matching the module's forward (batch of feature vectors).
    N1, IN1, OUT1 = 8, 32, 64
    x1 = jax.random.normal(kx1, (N1, IN1), dtype=jnp.float32)
    w1 = init_weight(kw1, IN1, OUT1)
    out1 = jax.block_until_ready(normed_linear(x1, w1))
    ref1 = reference(x1, w1)
    assert out1.shape == (N1, OUT1)
    assert jnp.allclose(out1, ref1, atol=1e-4, rtol=1e-4), float(
        jnp.max(jnp.abs(out1 - ref1)))

    # Unaligned shape with explicit small tiles to exercise the full
    # (M, N, K) grid, K-axis accumulation, and padding/slicing paths.
    N2, IN2, OUT2 = 72, 300, 200
    x2 = jax.random.normal(kx2, (N2, IN2), dtype=jnp.float32)
    w2 = init_weight(kw2, IN2, OUT2)
    out2 = jax.block_until_ready(
        normed_linear(x2, w2, tm=32, tn=128, tk=128))
    ref2 = reference(x2, w2)
    assert out2.shape == (N2, OUT2)
    assert jnp.allclose(out2, ref2, atol=1e-4, rtol=1e-4), float(
        jnp.max(jnp.abs(out2 - ref2)))

    print("KERNEL_OK")
</pallas_src>

<mosaic_0001>
module attributes {stable_mosaic.version = 11 : i64} {
  func.func @_normed_linear_kernel(%arg0: i32, %arg1: i32, %arg2: i32, %arg3: memref<8x128xf32, #tpu.memory_space<vmem>>, %arg4: memref<128x128xf32, #tpu.memory_space<vmem>>, %arg5: memref<8x128xf32, #tpu.memory_space<vmem>>, %arg6: memref<8x128xf32, #tpu.memory_space<vmem>>, %arg7: memref<8x1xf32, #tpu.memory_space<vmem>>, %arg8: memref<1x128xf32, #tpu.memory_space<vmem>>) attributes {dimension_semantics = [#tpu.dimension_semantics<parallel>, #tpu.dimension_semantics<parallel>, #tpu.dimension_semantics<arbitrary>], iteration_bounds = array<i64: 1, 1, 1>, scalar_prefetch = 0 : i64, scratch_operands = 3 : i64, tpu.core_type = #tpu.core_type<tc>, window_params = [{transform_indices = @transform_0, window_bounds = array<i64: 8, 128>}, {transform_indices = @transform_1, window_bounds = array<i64: 128, 128>}, {transform_indices = @transform_2, window_bounds = array<i64: 8, 128>}]} {
    %c0_i32 = arith.constant 0 : i32
    %0 = arith.cmpi eq, %arg2, %c0_i32 : i32
    %1 = arith.extui %0 : i1 to i32
    %c0_i32_0 = arith.constant 0 : i32
    %2 = arith.cmpi ne, %1, %c0_i32_0 : i32
    scf.if %2 {
      %cst_20 = arith.constant 0.000000e+00 : f32
      %24 = vector.broadcast %cst_20 : f32 to vector<8x128xf32>
      %c0_21 = arith.constant 0 : index
      %c0_22 = arith.constant 0 : index
      %25 = vector.load %arg6[%c0_21, %c0_22] : memref<8x128xf32, #tpu.memory_space<vmem>>, vector<8x128xf32>
      tpu.vector_store %arg6[%c0_21, %c0_22], %24 {strides = array<i32>} : memref<8x128xf32, #tpu.memory_space<vmem>>, vector<8x128xf32>,
      %cst_23 = arith.constant 0.000000e+00 : f32
      %26 = vector.broadcast %cst_23 : f32 to vector<8x1xf32>
      %c0_24 = arith.constant 0 : index
      %c0_25 = arith.constant 0 : index
      %27 = vector.load %arg7[%c0_24, %c0_25] : memref<8x1xf32, #tpu.memory_space<vmem>>, vector<8x1xf32>
      tpu.vector_store %arg7[%c0_24, %c0_25], %26 {strides = array<i32>} : memref<8x1xf32, #tpu.memory_space<vmem>>, vector<8x1xf32>,
      %cst_26 = arith.constant 0.000000e+00 : f32
      %28 = vector.broadcast %cst_26 : f32 to vector<1x128xf32>
      %c0_27 = arith.constant 0 : index
      %c0_28 = arith.constant 0 : index
      %29 = vector.load %arg8[%c0_27, %c0_28] : memref<1x128xf32, #tpu.memory_space<vmem>>, vector<1x128xf32>
      tpu.vector_store %arg8[%c0_27, %c0_28], %28 {strides = array<i32>} : memref<1x128xf32, #tpu.memory_space<vmem>>, vector<1x128xf32>,
    } else {
    }
    %c0 = arith.constant 0 : index
    %c0_1 = arith.constant 0 : index
    %3 = vector.load %arg3[%c0, %c0_1] : memref<8x128xf32, #tpu.memory_space<vmem>>, vector<8x128xf32>
    %c0_2 = arith.constant 0 : index
    %c0_3 = arith.constant 0 : index
    %4 = vector.load %arg4[%c0_2, %c0_3] : memref<128x128xf32, #tpu.memory_space<vmem>>, vector<128x128xf32>
    %c0_4 = arith.constant 0 : index
    %c0_5 = arith.constant 0 : index
    %5 = vector.load %arg6[%c0_4, %c0_5] : memref<8x128xf32, #tpu.memory_space<vmem>>, vector<8x128xf32>
    %cst = arith.constant dense<0.000000e+00> : vector<8x128xf32>
    %6 = tpu.matmul %3, %4, %cst {dimension_numbers = #tpu.dot_dimension_numbers<[1], [0], [0], [1], [0, 0, 1, 1], [], []>} : vector<8x128xf32>, vector<128x128xf32>, vector<8x128xf32> -> vector<8x128xf32>
    %7 = arith.addf %5, %6 : vector<8x128xf32>
    %c0_6 = arith.constant 0 : index
    %c0_7 = arith.constant 0 : index
    %8 = vector.load %arg6[%c0_6, %c0_7] : memref<8x128xf32, #tpu.memory_space<vmem>>, vector<8x128xf32>
    tpu.vector_store %arg6[%c0_6, %c0_7], %7 {strides = array<i32>} : memref<8x128xf32, #tpu.memory_space<vmem>>, vector<8x128xf32>,
    %c0_8 = arith.constant 0 : index
    %c0_9 = arith.constant 0 : index
    %9 = vector.load %arg7[%c0_8, %c0_9] : memref<8x1xf32, #tpu.memory_space<vmem>>, vector<8x1xf32>
    %10 = arith.mulf %3, %3 : vector<8x128xf32>
    %cst_10 = arith.constant dense<0.000000e+00> : vector<8xf32>
    %11 = vector.multi_reduction <add>, %10, %cst_10 [1] : vector<8x128xf32> to vector<8xf32>
    %12 = vector.shape_cast %11 : vector<8xf32> to vector<8x1xf32>
    %13 = arith.addf %9, %12 : vector<8x1xf32>
    %c0_11 = arith.constant 0 : index
    %c0_12 = arith.constant 0 : index
    %14 = vector.load %arg7[%c0_11, %c0_12] : memref<8x1xf32, #tpu.memory_space<vmem>>, vector<8x1xf32>
    tpu.vector_store %arg7[%c0_11, %c0_12], %13 {strides = array<i32>} : memref<8x1xf32, #tpu.memory_space<vmem>>, vector<8x1xf32>,
    %c0_13 = arith.constant 0 : index
    %c0_14 = arith.constant 0 : index
    %15 = vector.load %arg8[%c0_13, %c0_14] : memref<1x128xf32, #tpu.memory_space<vmem>>, vector<1x128xf32>
    %16 = arith.mulf %4, %4 : vector<128x128xf32>
    %cst_15 = arith.constant dense<0.000000e+00> : vector<128xf32>
    %17 = vector.multi_reduction <add>, %16, %cst_15 [0] : vector<128x128xf32> to vector<128xf32>
    %18 = vector.shape_cast %17 : vector<128xf32> to vector<1x128xf32>
    %19 = arith.addf %15, %18 : vector<1x128xf32>
    %c0_16 = arith.constant 0 : index
    %c0_17 = arith.constant 0 : index
    %20 = vector.load %arg8[%c0_16, %c0_17] : memref<1x128xf32, #tpu.memory_space<vmem>>, vector<1x128xf32>
    tpu.vector_store %arg8[%c0_16, %c0_17], %19 {strides = array<i32>} : memref<1x128xf32, #tpu.memory_space<vmem>>, vector<1x128xf32>,
    %c0_i32_18 = arith.constant 0 : i32
    %21 = arith.cmpi eq, %arg2, %c0_i32_18 : i32
    %22 = arith.extui %21 : i1 to i32
    %c0_i32_19 = arith.constant 0 : i32
    %23 = arith.cmpi ne, %22, %c0_i32_19 : i32
    scf.if %23 {
      %c0_20 = arith.constant 0 : index
      %c0_21 = arith.constant 0 : index
      %24 = vector.load %arg7[%c0_20, %c0_21] : memref<8x1xf32, #tpu.memory_space<vmem>>, vector<8x1xf32>
      %cst_22 = arith.constant 1.000000e-24 : f32
      %25 = vector.broadcast %cst_22 : f32 to vector<8x1xf32>
      %26 = arith.maximumf %24, %25 : vector<8x1xf32>
      %27 = math.rsqrt %26 : vector<8x1xf32>
      %c0_23 = arith.constant 0 : index
      %c0_24 = arith.constant 0 : index
      %28 = vector.load %arg8[%c0_23, %c0_24] : memref<1x128xf32, #tpu.memory_space<vmem>>, vector<1x128xf32>
      %cst_25 = arith.constant 1.000000e-24 : f32
      %29 = vector.broadcast %cst_25 : f32 to vector<1x128xf32>
      %30 = arith.maximumf %28, %29 : vector<1x128xf32>
      %31 = math.rsqrt %30 : vector<1x128xf32>
      %c0_26 = arith.constant 0 : index
      %c0_27 = arith.constant 0 : index
      %32 = vector.load %arg6[%c0_26, %c0_27] : memref<8x128xf32, #tpu.memory_space<vmem>>, vector<8x128xf32>
      %33 = vector.broadcast %27 : vector<8x1xf32> to vector<8x128xf32>
      %34 = arith.mulf %32, %33 : vector<8x128xf32>
      %35 = vector.broadcast %31 : vector<1x128xf32> to vector<8x128xf32>
      %36 = arith.mulf %34, %35 : vector<8x128xf32>
      %c0_28 = arith.constant 0 : index
      %c0_29 = arith.constant 0 : index
      %37 = vector.load %arg5[%c0_28, %c0_29] : memref<8x128xf32, #tpu.memory_space<vmem>>, vector<8x128xf32>
      tpu.vector_store %arg5[%c0_28, %c0_29], %36 {strides = array<i32>} : memref<8x128xf32, #tpu.memory_space<vmem>>, vector<8x128xf32>,
    } else {
    }
    return
  }
  func.func @transform_0(%arg0: i32, %arg1: i32, %arg2: i32) -> (i32, i32) {
    %c0_i32 = arith.constant 0 : i32
    return %arg0, %arg2 : i32, i32
  }
  func.func @transform_1(%arg0: i32, %arg1: i32, %arg2: i32) -> (i32, i32) {
    %c0_i32 = arith.constant 0 : i32
    return %arg2, %arg1 : i32, i32
  }
  func.func @transform_2(%arg0: i32, %arg1: i32, %arg2: i32) -> (i32, i32) {
    %c0_i32 = arith.constant 0 : i32
    return %arg0, %arg1 : i32, i32
  }
}

</mosaic_0001>

<bundles_post_ra>
// kernel: tpu_custom_call.1
= control target key start
LH: loop header
LB: loop body
LE: loop exit
PB: predicated region body
PF: predicated region fallthrough
CT: control target
= control target key end

     0   :  { %7 = vsyncpa [#allocation6], 0  ;;  %s432_s0 = inlined_call_operand.hbm [shape: f32[8,128], index: 0, kind: input, shape index: {}]   ;;  %s433_s1 = inlined_call_operand.hbm [shape: f32[128,128], index: 1, kind: input, shape index: {}]   ;;  %s434_s2 = inlined_call_operand.hbm [shape: f32[8,128], index: 2, kind: output, shape index: {}]  }
   0x1   :  { %8 = vsyncpa [#allocation9], 0 }
   0x2   :  { %9 = vsyncpa [#allocation7], 0  ;;  %s354_s9 = smov [#allocation5]   ;;  %s355_s11 = smov [#allocation8]  }
   0x3   :  { %s16_s10 = sshll.u32 %s354_s9, 4  ;;  %s25_s12 = sshll.u32 %s355_s11, 4  ;;  %s17_s10 = int_to_ptr.vmem [resolvable:$true] %s16_s10  ;;  %s26_s12 = int_to_ptr.vmem [resolvable:$true] %s25_s12 }
   0x4   :  { %s296_s13 = scalar_lea.vmem %s17_s10, 128  ;;  %p301_p1 = scmp.lt.s32.totalorder %s17_s10, %s17_s10 }
   0x5   :  { %p297_p0 = scmp.ne.s32.totalorder %s17_s10, %s296_s13  ;;  %p302_p2 = scmp.lt.s32.totalorder %s296_s13, %s296_s13 }
   0x7   :  { %p303_p3 = por %p302_p2, %p301_p1 }
   0x9   :  { %p304_p4 = pnand %p303_p3, %p297_p0 }
   0xb   :  { %307 = shalt.err (!%p304_p4)
}
   0xc   :  { %19 = dma.hbm_to_vmem [thread:$0]  %s432_s0, 128, %s17_s10, [#allocation6]  }
   0xd   :  { %s316_s16 = scalar_lea.vmem %s26_s12, 2048  ;;  %p321_p6 = scmp.lt.s32.totalorder %s26_s12, %s26_s12 }
   0xe   :  { %p317_p5 = scmp.ne.s32.totalorder %s26_s12, %s316_s16  ;;  %p322_p7 = scmp.lt.s32.totalorder %s316_s16, %s316_s16 }
  0x10   :  { %p323_p8 = por %p322_p7, %p321_p6 }
  0x12   :  { %p324_p9 = pnand %p323_p8, %p317_p5 }
  0x14   :  { %327 = shalt.err (!%p324_p9)
}
  0x15   :  { %s356_s17 = smov 128   ;;  %s357_s18 = smov 8  }
  0x16   :  { %31 = dma.hbm_to_vmem [thread:$0]  %s433_s1, 2048, %s26_s12, [#allocation9], %s356_s17, %s356_s17, %s357_s18  }
  0x17   :  { %348 = dma.done.wait [#allocation6], 128  }
  0x18   :  { %349 = vsyncadd [#allocation6], 4294967168 }
  0x19   :  { %350 = dma.done.wait [#allocation9], 2048  }
  0x1a   :  { %351 = vsyncadd [#allocation9], 4294965248  ;;  %vm43_vm0 = vcmask 7168   ;;  %v358_v0 = vmov 0.0   ;;  %vm359_vm1 = vmmov 0   ;;  %v388_v1 = vld [vmem:[#allocation5] sm:$0xff] }
  0x1b   :  { %240 = vmatprep.subr.mxu0 %v358_v0  ;;  %45 = vst [vmem:[#allocation4] sm:$0x1] %v358_v0  ;;  %272 = vmatprep.mubr.msk.f32.mxu0 %vm359_vm1, %v358_v0  ;;  %44 = vst.msk [vmem:[#allocation3] sm:$0xff] %vm43_vm0, %v358_v0  ;;  %v390_v2 = vld [vmem:[#allocation8 + $0x78] sm:$0xff]  ;;  %v392_v3 = vld [vmem:[#allocation8 + $0x70] sm:$0xff]  ;;  %v137_v4 = vmul.f32 %v388_v1, %v388_v1  ;;  %v360_v32 = vmov 0  }
  0x1c   :  { %241 = vmatpush3.msra.mxu0 %v390_v2  ;;  %v398_v5 = vld [vmem:[#allocation8 + $0x68] sm:$0xff]  ;;  %v59_v6 = vld [vmem:[#allocation8 + $0x60] sm:$0xff]  ;;  %v49_v9 = vld [vmem:[#allocation8 + $0x10] sm:$0xff]  ;;  %283 = vset.pattern.permute.xlu0 %v360_v32  ;;  %v158_v45 = vmul.f32 %v392_v3, %v392_v3  ;;  %v159_v47 = vmul.f32 %v390_v2, %v390_v2  ;;  %s361_s0 = smov [#allocation10]  }
  0x1d   :  { %242 = vmatprep.subr.mxu0 %v358_v0  ;;  %138 = vadd.xlane.f32.xlu0 %v137_v4  ;;  %v402_v7 = vld [vmem:[#allocation8] sm:$0xff]  ;;  %v48_v8 = vld [vmem:[#allocation8 + $0x8] sm:$0xff]  ;;  %v58_v11 = vld [vmem:[#allocation8 + $0x58] sm:$0xff]  ;;  %v146_v13 = vmul.f32 %v49_v9, %v49_v9  ;;  %v156_v41 = vmul.f32 %v59_v6, %v59_v6  ;;  %v157_v43 = vmul.f32 %v398_v5, %v398_v5  ;;  %s213_s1 = sshll.u32 %s361_s0, 4  ;;  %s214_s1 = int_to_ptr.vmem [resolvable:$true] %s213_s1 }
  0x1e   :  { %243 = vmatpush3.msra.mxu0 %v392_v3  ;;  %v144_v10 = vmul.f32 %v402_v7, %v402_v7  ;;  %v145_v12 = vmul.f32 %v48_v8, %v48_v8  ;;  %v50_v14 = vld [vmem:[#allocation8 + $0x18] sm:$0xff]  ;;  %v57_v15 = vld [vmem:[#allocation8 + $0x50] sm:$0xff]  ;;  %v51_v18 = vld [vmem:[#allocation8 + $0x20] sm:$0xff]  ;;  %v155_v39 = vmul.f32 %v58_v11, %v58_v11  ;;  %s328_s21 = scalar_lea.vmem %s214_s1, 128  ;;  %p333_p11 = scmp.lt.s32.totalorder %s214_s1, %s214_s1 }
  0x1f   :  { %244 = vmatprep.subr.mxu0 %v358_v0  ;;  %v147_v16 = vmul.f32 %v50_v14, %v50_v14  ;;  %v56_v19 = vld [vmem:[#allocation8 + $0x48] sm:$0xff]  ;;  %v148_v20 = vmul.f32 %v51_v18, %v51_v18  ;;  %v55_v23 = vld [vmem:[#allocation8 + $0x40] sm:$0xff]  ;;  %v53_v26 = vld [vmem:[#allocation8 + $0x30] sm:$0xff]  ;;  %v154_v37 = vmul.f32 %v57_v15, %v57_v15  ;;  %p329_p10 = scmp.ne.s32.totalorder %s214_s1, %s328_s21  ;;  %p334_p12 = scmp.lt.s32.totalorder %s328_s21, %s328_s21 }
  0x20   :  { %245 = vmatpush3.msra.mxu0 %v398_v5  ;;  %v160_v17 = vadd.f32 %v145_v12, %v144_v10  ;;  %v52_v22 = vld [vmem:[#allocation8 + $0x28] sm:$0xff]  ;;  %v54_v27 = vld [vmem:[#allocation8 + $0x38] sm:$0xff]  ;;  %v150_v28 = vmul.f32 %v53_v26, %v53_v26  ;;  %v152_v33 = vmul.f32 %v55_v23, %v55_v23  ;;  %v153_v35 = vmul.f32 %v56_v19, %v56_v19 }
  0x21   :  { %246 = vmatprep.subr.mxu0 %v358_v0  ;;  %v149_v24 = vmul.f32 %v52_v22, %v52_v22  ;;  %v151_v30 = vmul.f32 %v54_v27, %v54_v27  ;;  %v200_v5 = vlaneseq  ;;  %p335_p13 = por %p334_p12, %p333_p11 }
  0x22   :  { %247 = vmatpush3.msra.mxu0 %v59_v6  ;;  %v161_v21 = vadd.f32 %v160_v17, %v146_v13  ;;  %v143_v56 = vld [vmem:[#allocation4] sm:$0x1]  ;;  %v136_v59 = vld [vmem:[#allocation3] sm:$0xff] }
  0x23   :  { %248 = vmatprep.subr.mxu0 %v358_v0  ;;  %v201_v6 = vshrl.u32 %v200_v5, 7  ;;  %p336_p0 = pnand %p335_p13, %p329_p10 }
  0x24   :  { %249 = vmatpush3.msra.mxu0 %v58_v11  ;;  %v162_v25 = vadd.f32 %v161_v21, %v147_v16 }
  0x25   :  { %250 = vmatprep.subr.mxu0 %v358_v0 }
  0x26   :  { %251 = vmatpush3.msra.mxu0 %v57_v15  ;;  %v163_v29 = vadd.f32 %v162_v25, %v148_v20 }
  0x27   :  { %252 = vmatprep.subr.mxu0 %v358_v0 }
  0x28   :  { %253 = vmatpush3.msra.mxu0 %v56_v19  ;;  %v164_v31 = vadd.f32 %v163_v29, %v149_v24 }
  0x29   :  { %254 = vmatprep.subr.mxu0 %v358_v0 }
  0x2a   :  { %255 = vmatpush3.msra.mxu0 %v55_v23  ;;  %v165_v34 = vadd.f32 %v164_v31, %v150_v28 }
  0x2b   :  { %256 = vmatprep.subr.mxu0 %v358_v0 }
  0x2c   :  { %257 = vmatpush3.msra.mxu0 %v54_v27  ;;  %v166_v36 = vadd.f32 %v165_v34, %v151_v30 }
  0x2d   :  { %258 = vmatprep.subr.mxu0 %v358_v0 }
  0x2e   :  { %259 = vmatpush3.msra.mxu0 %v53_v26  ;;  %v167_v38 = vadd.f32 %v166_v36, %v152_v33 }
  0x2f   :  { %260 = vmatprep.subr.mxu0 %v358_v0 }
  0x30   :  { %261 = vmatpush3.msra.mxu0 %v52_v22  ;;  %v168_v40 = vadd.f32 %v167_v38, %v153_v35 }
  0x31   :  { %262 = vmatprep.subr.mxu0 %v358_v0 }
  0x32   :  { %263 = vmatpush3.msra.mxu0 %v51_v18  ;;  %v169_v42 = vadd.f32 %v168_v40, %v154_v37 }
  0x33   :  { %264 = vmatprep.subr.mxu0 %v358_v0 }
  0x34   :  { %265 = vmatpush3.msra.mxu0 %v50_v14  ;;  %v170_v44 = vadd.f32 %v169_v42, %v155_v39 }
  0x35   :  { %266 = vmatprep.subr.mxu0 %v358_v0 }
  0x36   :  { %267 = vmatpush3.msra.mxu0 %v49_v9  ;;  %v171_v46 = vadd.f32 %v170_v44, %v156_v41 }
  0x37   :  { %268 = vmatprep.subr.mxu0 %v358_v0 }
  0x38   :  { %269 = vmatpush3.msra.mxu0 %v48_v8  ;;  %v172_v48 = vadd.f32 %v171_v46, %v157_v43 }
  0x39   :  { %270 = vmatprep.subr.mxu0 %v358_v0 }
  0x3a   :  { %271 = vmatpush3.msra.mxu0 %v402_v7  ;;  %v173_v49 = vadd.f32 %v172_v48, %v158_v45  ;;  %v202_v7 = vsub.s32 0, %v201_v6 }
  0x3b   :  { %273 = vmatmul.mubr.f32.vlgmr.msra.gmra.mxu0 %v388_v1 }
  0x3c   :  { %v174_v50 = vadd.f32 %v173_v49, %v159_v47 }
  0x3e   :  { %v175_v51 = vrot.slane %v174_v50, 4 }
  0x40   :  { %v176_v52 = vadd.f32 %v175_v51, %v174_v50 }
  0x42   :  { %v177_v53 = vrot.slane %v176_v52, 2 }
  0x44   :  { %v178_v54 = vadd.f32 %v177_v53, %v176_v52 }
  0x46   :  { %v179_v55 = vrot.slane %v178_v54, 1 }
  0x48   :  { %v180_v57 = vadd.f32 %v179_v55, %v178_v54 }
  0x4a   :  { %v181_v58 = vadd.f32 %v180_v57, %v143_v56 }
  0x4c   :  { %182 = vst [vmem:[#allocation4] sm:$0x1] %v181_v58 }
  0x53   :  { %v189_v3 = vld [vmem:[#allocation4] sm:$0x1] }
  0x54   :  { %v190_v4 = vmax.f32 %v189_v3, 1e-24 }
  0xa6   :  { %v139_v60 = vpop.xlane.xlu0 %138 }
  0xa7   :  { %v140_v61 = vadd.f32 %v139_v60, %v136_v59 }
  0xa9   :  { %142 = vst.msk [vmem:[#allocation3] sm:$0xff] %vm43_vm0, %v140_v61 }
  0xb0   :  { %v186_v62 = vld [vmem:[#allocation3] sm:$0xff] }
  0xb1   :  { %v187_v63 = vmax.f32 %v186_v62, 1e-24 }
  0xb3   :  { %284 = vrsqrt.f32 %v187_v63 }
  0xb4   :  { %286 = vrsqrt.f32 %v190_v4 }
  0xc0   :  { %v285_v0 = vpop.eup %284 }
  0xc1   :  { %195 = vperm.xlu0 %283, %v285_v0   ;;  %v287_v8 = vpop.eup %286 }
  0xc2   :  { %v203_v9 = vrot.slane %v287_v8, %v202_v7 }
  0xfb   :  { %v130_v1 = vpop.f32.mrf.mxu0 }
  0xfd   :  { %v274_v2 = vpop.f32.mrf.mxu0 }
 0x13c   :  { %v196_v10 = vpop.permute.xlu0 %195 }
 0x13d   :  { %v198_v11 = vmul.f32 %v196_v10, %v130_v1 }
 0x13f   :  { %v205_v12 = vmul.f32 %v203_v9, %v198_v11 }
 0x141   :  { %206 = vst [vmem:[#allocation10] sm:$0xff] %v205_v12 }
 0x142   :  { %339 = shalt.err (!%p336_p0)
}
 0x143   :  { %216 = dma.vmem_to_hbm [thread:$0]  %s214_s1, 128, %s434_s2, [#allocation7]  }
 0x144   :  { %352 = dma.done.wait [#allocation7], 128  }
 0x145   :  { %353 = vsyncadd [#allocation7], 4294967168 }
 0x146   :  { %220 = vsyncpa [#allocation6], 1 }
 0x147   :  { %221 = vsyncpa [#allocation9], 1 }
 0x148   :  { %222 = vsyncpa [#allocation7], 1 }

</bundles_post_ra>
